<compile_context>
chip_gen: v5e
topology: v5e:2x2
jax: 0.10.0
libtpu: 0.0.40
codegen_flags: <defaults>
</compile_context>

<pallas_src>
import functools

import jax
import jax.numpy as jnp
import numpy as np
from jax.experimental import pallas as pl
from jax.experimental.pallas import tpu as pltpu

NEG = -1.0e9      # finite "minus infinity" for masking (avoids inf/NaN propagation)
LANES = 128       # lane width hidden features / logits are zero-padded to


def gnn_kernel(x_ref, g_ref, w_ref, out_ref, *, n_nodes, g_pad, f_in_pad, lanes):
    """Whole-graph GNN forward in a single invocation.

    x_ref : [N, f_in_pad]        node features, zero-padded feature lanes
    g_ref : [2N + g_pad, N]      rows 0:N  = A + I, rows N:2N = S^K,
                                 rows 2N:  = additive pooling mask (0 member / NEG other)
    w_ref : [8 + f_in_pad + 4*lanes, lanes]  packed weights/biases, zero padded;
                                 row 4 (bn) carries NEG on lanes >= num_classes
    out_ref: [g_pad, lanes]      lane-dense log-softmax; caller slices [:G, :C]
    """
    f32 = jnp.float32
    n = n_nodes
    dot = lambda a, b: jnp.dot(a, b, preferred_element_type=f32)

    adj_i = g_ref[0:n, :]                       # [N, N]  A + I
    s_k = g_ref[n:2 * n, :]                     # [N, N]  S^K (precomputed)
    pool_bias = g_ref[2 * n:2 * n + g_pad, :]   # [g_pad, N]

    b1 = w_ref[0:1, :]
    bs1 = w_ref[1:2, :]
    bs2 = w_ref[2:3, :]
    b2 = w_ref[3:4, :]
    bn = w_ref[4:5, :]
    r = 8
    w1 = w_ref[r:r + f_in_pad, :]
    r += f_in_pad
    ws1 = w_ref[r:r + lanes, :]
    r += lanes
    ws2 = w_ref[r:r + lanes, :]
    r += lanes
    w2 = w_ref[r:r + lanes, :]
    r += lanes
    wn = w_ref[r:r + lanes, :]

    x = x_ref[...]

    # GINConv #1 (eps = 0): ReLU(((A + I) x) W1 + b1)
    h = jnp.maximum(dot(dot(adj_i, x), w1) + b1, 0.0)

    # SGConv #1 / #2 (K = 5): a single propagation matmul each with precomputed S^K
    h = dot(dot(s_k, h), ws1) + bs1
    h = dot(dot(s_k, h), ws2) + bs2

    # GINConv #2: ReLU(((A + I) h) W2 + b2)
    h = jnp.maximum(dot(dot(adj_i, h), w2) + b2, 0.0)

    # scatter_max over batch, all graphs at once:
    # pooled[g, f] = max_i ( h[i, f] + pool_bias[g, i] )
    pooled = jnp.max(h[None, :, :] + pool_bias[:, :, None], axis=1)   # [g_pad, lanes]

    # classifier head + log-softmax; padding lanes hold NEG via bn -> exp underflows to 0
    z = dot(pooled, wn) + bn
    zmax = jnp.max(z, axis=1, keepdims=True)
    lse = jnp.log(jnp.sum(jnp.exp(z - zmax), axis=1, keepdims=True)) + zmax
    out_ref[...] = z - lse


def precompute_propagation(adj, s_mat, k_hops=5):
    """A + I (GIN aggregation) and S^K (SGConv propagation), computed once."""
    n = adj.shape[0]
    adj_i = adj + jnp.eye(n, dtype=adj.dtype)
    s_k = s_mat
    for _ in range(k_hops - 1):
        s_k = jnp.dot(s_k, s_mat)
    return adj_i, s_k


def pack_weights(params, *, f_in_pad, lanes):
    """Pack all weights/biases into one zero-padded [8 + f_in_pad + 4*lanes, lanes] slab."""
    hdim = params["ws1T"].shape[0]      # 30
    cdim = params["wnT"].shape[1]       # 3
    f_in = params["w1T"].shape[0]       # 5
    rows = 8 + f_in_pad + 4 * lanes
    slab = np.zeros((rows, lanes), np.float32)
    slab[0, :hdim] = np.asarray(params["b1"]).ravel()
    slab[1, :hdim] = np.asarray(params["bs1"]).ravel()
    slab[2, :hdim] = np.asarray(params["bs2"]).ravel()
    slab[3, :hdim] = np.asarray(params["b2"]).ravel()
    slab[4, :] = NEG                                   # mask padded logit lanes
    slab[4, :cdim] = np.asarray(params["bn"]).ravel()
    r = 8
    slab[r:r + f_in, :hdim] = np.asarray(params["w1T"])
    r = 8 + f_in_pad
    slab[r:r + hdim, :hdim] = np.asarray(params["ws1T"]); r += lanes
    slab[r:r + hdim, :hdim] = np.asarray(params["ws2T"]); r += lanes
    slab[r:r + hdim, :hdim] = np.asarray(params["w2T"]);  r += lanes
    slab[r:r + hdim, :cdim] = np.asarray(params["wnT"])
    return jnp.asarray(slab)


def net_forward(x, adj_i, s_k, mask, params):
    n, f_in = x.shape
    g = mask.shape[0]
    cdim = params["wnT"].shape[1]
    f_in_pad = ((f_in + 7) // 8) * 8          # 5  -> 8
    g_pad = max(8, ((g + 7) // 8) * 8)        # 2  -> 8 (lane-dense, sublane-aligned out)

    # node features, zero-padded feature lanes
    x_pad = jnp.zeros((n, f_in_pad), jnp.float32).at[:, :f_in].set(x)

    # additive pooling mask: 0 for member nodes, NEG otherwise; padded graph rows
    # behave as "all members" (finite garbage rows, sliced off below)
    mask_pad = jnp.ones((g_pad, n), jnp.float32).at[:g, :].set(mask)
    pool_bias = (1.0 - mask_pad) * NEG

    graph_slab = jnp.concatenate([adj_i, s_k, pool_bias], axis=0)   # [2n + g_pad, n]
    w_slab = pack_weights(params, f_in_pad=f_in_pad, lanes=LANES)

    out_pad = pl.pallas_call(
        functools.partial(gnn_kernel, n_nodes=n, g_pad=g_pad,
                          f_in_pad=f_in_pad, lanes=LANES),
        out_shape=jax.ShapeDtypeStruct((g_pad, LANES), jnp.float32),
        in_specs=[pl.BlockSpec(memory_space=pltpu.MemorySpace.VMEM)
                  for _ in range(3)],
        out_specs=pl.BlockSpec(memory_space=pltpu.MemorySpace.VMEM),
    )(x_pad, graph_slab, w_slab)
    return out_pad[:g, :cdim]


def reference_forward(x, adj_i, s_k, mask, params):
    # Pure-JAX mirror of the module's forward for correctness checking.
    h = adj_i @ x
    h = jnp.maximum(h @ params["w1T"] + params["b1"], 0.0)
    h = (s_k @ h) @ params["ws1T"] + params["bs1"]
    h = (s_k @ h) @ params["ws2T"] + params["bs2"]
    h = adj_i @ h
    h = jnp.maximum(h @ params["w2T"] + params["b2"], 0.0)
    masked = jnp.where(mask[:, :, None] > 0.5, h[None, :, :], -jnp.inf)
    pooled = jnp.max(masked, axis=1)
    z = pooled @ params["wnT"] + params["bn"]
    return jax.nn.log_softmax(z, axis=1)


def make_params(key):
    ks = jax.random.split(key, 10)
    scale = 0.1
    return {
        # stored already transposed to [in, out]; biases as [1, out]
        "w1T": jax.random.normal(ks[0], (5, 30), jnp.float32) * scale,
        "b1": jax.random.normal(ks[1], (1, 30), jnp.float32) * scale,
        "ws1T": jax.random.normal(ks[2], (30, 30), jnp.float32) * scale,
        "bs1": jax.random.normal(ks[3], (1, 30), jnp.float32) * scale,
        "ws2T": jax.random.normal(ks[4], (30, 30), jnp.float32) * scale,
        "bs2": jax.random.normal(ks[5], (1, 30), jnp.float32) * scale,
        "w2T": jax.random.normal(ks[6], (30, 30), jnp.float32) * scale,
        "b2": jax.random.normal(ks[7], (1, 30), jnp.float32) * scale,
        "wnT": jax.random.normal(ks[8], (30, 3), jnp.float32) * scale,
        "bn": jax.random.normal(ks[9], (1, 3), jnp.float32) * scale,
    }


def build_graph(key, num_nodes=16, num_graphs=2, feat=5):
    # Two graphs of 8 nodes each; each graph is an undirected ring + one chord.
    nodes_per_graph = num_nodes // num_graphs
    src, dst = [], []
    for g in range(num_graphs):
        base = g * nodes_per_graph
        for i in range(nodes_per_graph):
            a = base + i
            b = base + (i + 1) % nodes_per_graph
            src += [a, b]
            dst += [b, a]
        a, b = base, base + nodes_per_graph // 2
        src += [a, b]
        dst += [b, a]
    src = np.asarray(src, np.int32)
    dst = np.asarray(dst, np.int32)

    x = jax.random.normal(key, (num_nodes, feat), jnp.float32)

    # aggregation matrix: adj[i, j] = 1 iff edge j -> i
    adj = jnp.zeros((num_nodes, num_nodes), jnp.float32).at[dst, src].set(1.0)

    # SGConv gcn_norm: S = D^-1/2 (A + I) D^-1/2
    a_hat = adj + jnp.eye(num_nodes, dtype=jnp.float32)
    deg = jnp.sum(a_hat, axis=1)
    d_inv_sqrt = 1.0 / jnp.sqrt(deg)
    s_mat = d_inv_sqrt[:, None] * a_hat * d_inv_sqrt[None, :]

    # batch vector -> membership mask [G, N]
    batch = np.repeat(np.arange(num_graphs), nodes_per_graph).astype(np.int32)
    mask = jnp.asarray((batch[None, :] == np.arange(num_graphs)[:, None]),
                       dtype=jnp.float32)
    return x, adj, s_mat, mask


if __name__ == "__main__":
    key = jax.random.PRNGKey(0)
    k_graph, k_params = jax.random.split(key)

    x, adj, s_mat, mask = build_graph(k_graph, num_nodes=16, num_graphs=2, feat=5)
    params = make_params(k_params)
    adj_i, s_k = precompute_propagation(adj, s_mat, k_hops=5)

    out = net_forward(x, adj_i, s_k, mask, params)
    out = jax.block_until_ready(out)

    ref = reference_forward(x, adj_i, s_k, mask, params)
    np.testing.assert_allclose(np.asarray(out), np.asarray(ref),
                               rtol=1e-4, atol=1e-5)
    assert out.shape == (2, 3) and out.dtype == jnp.float32
    print("KERNEL_OK")
</pallas_src>

<mosaic_0001>
module attributes {stable_mosaic.version = 11 : i64} {
  func.func @gnn_kernel(%arg0: memref<16x8xf32, #tpu.memory_space<vmem>>, %arg1: memref<40x16xf32, #tpu.memory_space<vmem>>, %arg2: memref<528x128xf32, #tpu.memory_space<vmem>>, %arg3: memref<8x128xf32, #tpu.memory_space<vmem>>) attributes {dimension_semantics = [], scalar_prefetch = 0 : i64, scratch_operands = 0 : i64, tpu.core_type = #tpu.core_type<tc>} {
    %c0 = arith.constant 0 : index
    %c0_0 = arith.constant 0 : index
    %0 = vector.load %arg1[%c0, %c0_0] : memref<40x16xf32, #tpu.memory_space<vmem>>, vector<16x16xf32>
    %c16 = arith.constant 16 : index
    %c0_1 = arith.constant 0 : index
    %1 = vector.load %arg1[%c16, %c0_1] : memref<40x16xf32, #tpu.memory_space<vmem>>, vector<16x16xf32>
    %c32 = arith.constant 32 : index
    %c0_2 = arith.constant 0 : index
    %2 = vector.load %arg1[%c32, %c0_2] : memref<40x16xf32, #tpu.memory_space<vmem>>, vector<8x16xf32>
    %c0_3 = arith.constant 0 : index
    %c0_4 = arith.constant 0 : index
    %3 = vector.load %arg2[%c0_3, %c0_4] : memref<528x128xf32, #tpu.memory_space<vmem>>, vector<1x128xf32>
    %c1 = arith.constant 1 : index
    %c0_5 = arith.constant 0 : index
    %4 = vector.load %arg2[%c1, %c0_5] : memref<528x128xf32, #tpu.memory_space<vmem>>, vector<1x128xf32>
    %c2 = arith.constant 2 : index
    %c0_6 = arith.constant 0 : index
    %5 = vector.load %arg2[%c2, %c0_6] : memref<528x128xf32, #tpu.memory_space<vmem>>, vector<1x128xf32>
    %c3 = arith.constant 3 : index
    %c0_7 = arith.constant 0 : index
    %6 = vector.load %arg2[%c3, %c0_7] : memref<528x128xf32, #tpu.memory_space<vmem>>, vector<1x128xf32>
    %c4 = arith.constant 4 : index
    %c0_8 = arith.constant 0 : index
    %7 = vector.load %arg2[%c4, %c0_8] : memref<528x128xf32, #tpu.memory_space<vmem>>, vector<1x128xf32>
    %c8 = arith.constant 8 : index
    %c0_9 = arith.constant 0 : index
    %8 = vector.load %arg2[%c8, %c0_9] : memref<528x128xf32, #tpu.memory_space<vmem>>, vector<8x128xf32>
    %c16_10 = arith.constant 16 : index
    %c0_11 = arith.constant 0 : index
    %9 = vector.load %arg2[%c16_10, %c0_11] : memref<528x128xf32, #tpu.memory_space<vmem>>, vector<128x128xf32>
    %c144 = arith.constant 144 : index
    %c0_12 = arith.constant 0 : index
    %10 = vector.load %arg2[%c144, %c0_12] : memref<528x128xf32, #tpu.memory_space<vmem>>, vector<128x128xf32>
    %c272 = arith.constant 272 : index
    %c0_13 = arith.constant 0 : index
    %11 = vector.load %arg2[%c272, %c0_13] : memref<528x128xf32, #tpu.memory_space<vmem>>, vector<128x128xf32>
    %c400 = arith.constant 400 : index
    %c0_14 = arith.constant 0 : index
    %12 = vector.load %arg2[%c400, %c0_14] : memref<528x128xf32, #tpu.memory_space<vmem>>, vector<128x128xf32>
    %c0_15 = arith.constant 0 : index
    %c0_16 = arith.constant 0 : index
    %13 = vector.load %arg0[%c0_15, %c0_16] : memref<16x8xf32, #tpu.memory_space<vmem>>, vector<16x8xf32>
    %cst = arith.constant dense<0.000000e+00> : vector<16x8xf32>
    %14 = tpu.matmul %0, %13, %cst {dimension_numbers = #tpu.dot_dimension_numbers<[1], [0], [0], [1], [0, 0, 1, 1], [], []>} : vector<16x16xf32>, vector<16x8xf32>, vector<16x8xf32> -> vector<16x8xf32>
    %cst_17 = arith.constant dense<0.000000e+00> : vector<16x128xf32>
    %15 = tpu.matmul %14, %8, %cst_17 {dimension_numbers = #tpu.dot_dimension_numbers<[1], [0], [0], [1], [0, 0, 1, 1], [], []>} : vector<16x8xf32>, vector<8x128xf32>, vector<16x128xf32> -> vector<16x128xf32>
    %16 = vector.broadcast %3 : vector<1x128xf32> to vector<16x128xf32>
    %17 = arith.addf %15, %16 : vector<16x128xf32>
    %cst_18 = arith.constant 0.000000e+00 : f32
    %18 = vector.broadcast %cst_18 : f32 to vector<16x128xf32>
    %19 = arith.maximumf %17, %18 : vector<16x128xf32>
    %cst_19 = arith.constant dense<0.000000e+00> : vector<16x128xf32>
    %20 = tpu.matmul %1, %19, %cst_19 {dimension_numbers = #tpu.dot_dimension_numbers<[1], [0], [0], [1], [0, 0, 1, 1], [], []>} : vector<16x16xf32>, vector<16x128xf32>, vector<16x128xf32> -> vector<16x128xf32>
    %cst_20 = arith.constant dense<0.000000e+00> : vector<16x128xf32>
    %21 = tpu.matmul %20, %9, %cst_20 {dimension_numbers = #tpu.dot_dimension_numbers<[1], [0], [0], [1], [0, 0, 1, 1], [], []>} : vector<16x128xf32>, vector<128x128xf32>, vector<16x128xf32> -> vector<16x128xf32>
    %22 = vector.broadcast %4 : vector<1x128xf32> to vector<16x128xf32>
    %23 = arith.addf %21, %22 : vector<16x128xf32>
    %cst_21 = arith.constant dense<0.000000e+00> : vector<16x128xf32>
    %24 = tpu.matmul %1, %23, %cst_21 {dimension_numbers = #tpu.dot_dimension_numbers<[1], [0], [0], [1], [0, 0, 1, 1], [], []>} : vector<16x16xf32>, vector<16x128xf32>, vector<16x128xf32> -> vector<16x128xf32>
    %cst_22 = arith.constant dense<0.000000e+00> : vector<16x128xf32>
    %25 = tpu.matmul %24, %10, %cst_22 {dimension_numbers = #tpu.dot_dimension_numbers<[1], [0], [0], [1], [0, 0, 1, 1], [], []>} : vector<16x128xf32>, vector<128x128xf32>, vector<16x128xf32> -> vector<16x128xf32>
    %26 = vector.broadcast %5 : vector<1x128xf32> to vector<16x128xf32>
    %27 = arith.addf %25, %26 : vector<16x128xf32>
    %cst_23 = arith.constant dense<0.000000e+00> : vector<16x128xf32>
    %28 = tpu.matmul %0, %27, %cst_23 {dimension_numbers = #tpu.dot_dimension_numbers<[1], [0], [0], [1], [0, 0, 1, 1], [], []>} : vector<16x16xf32>, vector<16x128xf32>, vector<16x128xf32> -> vector<16x128xf32>
    %cst_24 = arith.constant dense<0.000000e+00> : vector<16x128xf32>
    %29 = tpu.matmul %28, %11, %cst_24 {dimension_numbers = #tpu.dot_dimension_numbers<[1], [0], [0], [1], [0, 0, 1, 1], [], []>} : vector<16x128xf32>, vector<128x128xf32>, vector<16x128xf32> -> vector<16x128xf32>
    %30 = vector.broadcast %6 : vector<1x128xf32> to vector<16x128xf32>
    %31 = arith.addf %29, %30 : vector<16x128xf32>
    %cst_25 = arith.constant 0.000000e+00 : f32
    %32 = vector.broadcast %cst_25 : f32 to vector<16x128xf32>
    %33 = arith.maximumf %31, %32 : vector<16x128xf32>
    %34 = vector.shape_cast %33 : vector<16x128xf32> to vector<1x16x128xf32>
    %35 = vector.shape_cast %2 : vector<8x16xf32> to vector<8x16x1xf32>
    %36 = vector.broadcast %34 : vector<1x16x128xf32> to vector<8x16x128xf32>
    %37 = vector.broadcast %35 : vector<8x16x1xf32> to vector<8x16x128xf32>
    %38 = arith.addf %36, %37 : vector<8x16x128xf32>
    %cst_26 = arith.constant dense<0xFF800000> : vector<8x128xf32>
    %39 = vector.multi_reduction <maximumf>, %38, %cst_26 [1] : vector<8x16x128xf32> to vector<8x128xf32>
    %cst_27 = arith.constant dense<0.000000e+00> : vector<8x128xf32>
    %40 = tpu.matmul %39, %12, %cst_27 {dimension_numbers = #tpu.dot_dimension_numbers<[1], [0], [0], [1], [0, 0, 1, 1], [], []>} : vector<8x128xf32>, vector<128x128xf32>, vector<8x128xf32> -> vector<8x128xf32>
    %41 = vector.broadcast %7 : vector<1x128xf32> to vector<8x128xf32>
    %42 = arith.addf %40, %41 : vector<8x128xf32>
    %cst_28 = arith.constant dense<0xFF800000> : vector<8xf32>
    %43 = vector.multi_reduction <maximumf>, %42, %cst_28 [1] : vector<8x128xf32> to vector<8xf32>
    %44 = vector.shape_cast %43 : vector<8xf32> to vector<8x1xf32>
    %45 = vector.broadcast %44 : vector<8x1xf32> to vector<8x128xf32>
    %46 = arith.subf %42, %45 : vector<8x128xf32>
    %47 = math.exp %46 : vector<8x128xf32>
    %cst_29 = arith.constant dense<0.000000e+00> : vector<8xf32>
    %48 = vector.multi_reduction <add>, %47, %cst_29 [1] : vector<8x128xf32> to vector<8xf32>
    %49 = vector.shape_cast %48 : vector<8xf32> to vector<8x1xf32>
    %50 = math.log %49 : vector<8x1xf32>
    %51 = arith.addf %50, %44 : vector<8x1xf32>
    %52 = vector.broadcast %51 : vector<8x1xf32> to vector<8x128xf32>
    %53 = arith.subf %42, %52 : vector<8x128xf32>
    %c0_30 = arith.constant 0 : index
    %c0_31 = arith.constant 0 : index
    %54 = vector.load %arg3[%c0_30, %c0_31] : memref<8x128xf32, #tpu.memory_space<vmem>>, vector<8x128xf32>
    tpu.vector_store %arg3[%c0_30, %c0_31], %53 {strides = array<i32>} : memref<8x128xf32, #tpu.memory_space<vmem>>, vector<8x128xf32>,
    return
  }
}

</mosaic_0001>

<bundles_post_ra>
// kernel: tpu_custom_call.1
= control target key start
LH: loop header
LB: loop body
LE: loop exit
PB: predicated region body
PF: predicated region fallthrough
CT: control target
= control target key end

     0   :  { %8 = vsyncpa [#allocation3], 0  ;;  %s744_s0 = inlined_call_operand.vmem [shape: f32[16,8], index: 0, kind: input, shape index: {}]   ;;  %s745_s1 = inlined_call_operand.vmem [shape: f32[40,16], index: 1, kind: input, shape index: {}]   ;;  %s746_s2 = inlined_call_operand.hbm [shape: f32[528,128], index: 2, kind: input, shape index: {}]   ;;  %s747_s3 = inlined_call_operand.hbm [shape: f32[8,128], index: 3, kind: output, shape index: {}]  }
   0x1   :  { %9 = vsyncpa [#allocation4], 0  ;;  %s18_s14 = sshll.u32 %s746_s2, 4  ;;  %s655_s15 = smov [#allocation2]   ;;  %s19_s14 = int_to_ptr.hbm [resolvable:$true] %s18_s14 }
   0x2   :  { %s20_s16 = sshll.u32 %s655_s15, 4  ;;  %s656_s17 = smov 128   ;;  %s21_s16 = int_to_ptr.vmem [resolvable:$true] %s20_s16 }
   0x3   :  { %s657_s18 = smov 8  }
   0x4   :  { %26 = dma.hbm_to_vmem [thread:$0]  %s19_s14, 8448, %s21_s16, [#allocation3], %s656_s17, %s656_s17, %s657_s18  }
   0x5   :  { %651 = dma.done.wait [#allocation3], 8448  }
   0x6   :  { %652 = vsyncadd [#allocation3], 4294958848  ;;  %v107_v0 = vld [vmem:[%s744_s0 + $0x8] sm:$0xff]  ;;  %v106_v1 = vld [vmem:[%s744_s0] sm:$0xff]  ;;  %vm108_vm0 = vcmask 130048   ;;  %vm139_vm1 = vcmask 64512   ;;  %v321_v57 = vlaneseq }
   0x7   :  { %129 = vmatpush.msra.mxu0 %v107_v0  ;;  %v691_v2 = vld [vmem:[%s745_s1] sm:$0xff]  ;;  %v698_v3 = vld [vmem:[%s745_s1 + $0x8] sm:$0xff]  ;;  %v55_v9 = vld [vmem:[#allocation2 + $0x78] sm:$0xff]  ;;  %vm505_vm2 = vcmask 1041409   ;;  %vm507_vm3 = vcmask 1042434   ;;  %vm509_vm4 = vcmask 1043459  }
   0x8   :  { %v41_v4 = vld [vmem:[#allocation2 + $0x8] sm:$0xff]  ;;  %v56_v8 = vld [vmem:[#allocation2 + $0x80] sm:$0xff]  ;;  %v54_v10 = vld [vmem:[#allocation2 + $0x70] sm:$0xff]  ;;  %v712_v60 = vshrl.u32 %v321_v57, 7  ;;  %vm511_vm5 = vcmask 1044484   ;;  %vm513_vm6 = vcmask 1045509  }
   0x9   :  { %130 = vmatpush.msra.mxu0 %v106_v1  ;;  %161 = vmatpush.msra.mxu3 %v41_v4  ;;  %v57_v7 = vld [vmem:[#allocation2 + $0x88] sm:$0xff]  ;;  %v52_v13 = vld [vmem:[#allocation2 + $0x60] sm:$0xff]  ;;  %v51_v14 = vld [vmem:[#allocation2 + $0x58] sm:$0xff]  ;;  %vm515_vm7 = vcmask 1046534   ;;  %vm517_vm8 = vcmask 1047559   ;;  %s559_s7 = sshll.u32 %s747_s3, 4  ;;  %s560_s7 = int_to_ptr.hbm [resolvable:$true] %s559_s7 }
   0xa   :  { %569 = vmatmul.msk.f32.vlgmr.msra.gmra.mxu0 %vm108_vm0, %v691_v2  ;;  %v53_v11 = vld [vmem:[#allocation2 + $0x68] sm:$0xff]  ;;  %v50_v15 = vld [vmem:[#allocation2 + $0x50] sm:$0xff]  ;;  %v594_v16 = vld [vmem:[#allocation2] ss:$0 sm:$0xff]  ;;  %584 = vset.pattern.permute.xlu1 %v712_v60 }
   0xb   :  { %201 = vmatpush.msrb.mxu3 %v57_v7  ;;  %v49_v17 = vld [vmem:[#allocation2 + $0x48] sm:$0xff]  ;;  %v48_v19 = vld [vmem:[#allocation2 + $0x40] sm:$0xff]  ;;  %v47_v22 = vld [vmem:[#allocation2 + $0x38] sm:$0xff]  ;;  %585 = vset.pattern.permute.xlu2 %v712_v60 }
   0xc   :  { %v46_v24 = vld [vmem:[#allocation2 + $0x30] sm:$0xff]  ;;  %v45_v27 = vld [vmem:[#allocation2 + $0x28] sm:$0xff]  ;;  %v44_v28 = vld [vmem:[#allocation2 + $0x20] sm:$0xff]  ;;  %583 = vset.pattern.permute.xlu0 %v712_v60 }
   0xd   :  { %202 = vmatpush.msrb.mxu3 %v56_v8  ;;  %v33_v26 = vld [vmem:[%s745_s1 + $0x10] sm:$0xff]  ;;  %v43_v29 = vld [vmem:[#allocation2 + $0x18] sm:$0xff]  ;;  %v73_v34 = vld [vmem:[#allocation2 + $0x108] sm:$0xff] }
   0xe   :  { %v34_v30 = vld [vmem:[%s745_s1 + $0x18] sm:$0xff]  ;;  %v42_v31 = vld [vmem:[#allocation2 + $0x10] sm:$0xff]  ;;  %v72_v35 = vld [vmem:[#allocation2 + $0x100] sm:$0xff]  ;;  %248 = vmatpush.msrb.mxu0 %v73_v34 }
   0xf   :  { %203 = vmatpush.msrb.mxu3 %v55_v9  ;;  %v71_v36 = vld [vmem:[#allocation2 + $0xf8] sm:$0xff]  ;;  %v70_v37 = vld [vmem:[#allocation2 + $0xf0] sm:$0xff]  ;;  %v69_v38 = vld [vmem:[#allocation2 + $0xe8] sm:$0xff] }
  0x10   :  { %249 = vmatpush.msrb.mxu0 %v72_v35  ;;  %v68_v39 = vld [vmem:[#allocation2 + $0xe0] sm:$0xff]  ;;  %v67_v41 = vld [vmem:[#allocation2 + $0xd8] sm:$0xff]  ;;  %v66_v42 = vld [vmem:[#allocation2 + $0xd0] sm:$0xff] }
  0x11   :  { %204 = vmatpush.msrb.mxu3 %v54_v10  ;;  %v65_v43 = vld [vmem:[#allocation2 + $0xc8] sm:$0xff]  ;;  %v64_v44 = vld [vmem:[#allocation2 + $0xc0] sm:$0xff]  ;;  %v63_v47 = vld [vmem:[#allocation2 + $0xb8] sm:$0xff]  ;;  %v329_v10 = vadd.s32 8, %v712_v60 }
  0x12   :  { %570 = vmatmul.msk.f32.gmra.mxu0 %vm108_vm0, %v698_v3  ;;  %v595_v45 = vld [vmem:[#allocation2 + $0x1] ss:$0 sm:$0xff]  ;;  %v62_v49 = vld [vmem:[#allocation2 + $0xb0] sm:$0xff]  ;;  %v61_v51 = vld [vmem:[#allocation2 + $0xa8] sm:$0xff] }
  0x13   :  { %205 = vmatpush.msrb.mxu3 %v53_v11  ;;  %250 = vmatpush.msrb.mxu0 %v71_v36  ;;  %v60_v52 = vld [vmem:[#allocation2 + $0xa0] sm:$0xff]  ;;  %v59_v53 = vld [vmem:[#allocation2 + $0x98] sm:$0xff]  ;;  %v58_v54 = vld [vmem:[#allocation2 + $0x90] sm:$0xff] }
  0x14   :  { %v89_v58 = vld [vmem:[#allocation2 + $0x188] sm:$0xff]  ;;  %v88_v59 = vld [vmem:[#allocation2 + $0x180] sm:$0xff]  ;;  %v87_v61 = vld [vmem:[#allocation2 + $0x178] sm:$0xff] }
  0x15   :  { %206 = vmatpush.msrb.mxu3 %v52_v13  ;;  %251 = vmatpush.msrb.mxu0 %v70_v37  ;;  %v86_v62 = vld [vmem:[#allocation2 + $0x170] sm:$0xff]  ;;  %v719_v63 = vld [vmem:[%s745_s1 + $0x20] sm:$0xff]  ;;  %v85_v0 = vld [vmem:[#allocation2 + $0x168] sm:$0xff]  ;;  %s658_s1 = smov [#allocation5]  }
  0x16   :  { %v333_v1 = vperm.slane %v719_v63, 1  ;;  %v84_v4 = vld [vmem:[#allocation2 + $0x160] sm:$0xff]  ;;  %v83_v7 = vld [vmem:[#allocation2 + $0x158] sm:$0xff]  ;;  %v82_v8 = vld [vmem:[#allocation2 + $0x150] sm:$0xff]  ;;  %s557_s4 = sshll.u32 %s658_s1, 4  ;;  %s558_s4 = int_to_ptr.vmem [resolvable:$true] %s557_s4 }
  0x17   :  { %207 = vmatpush.msrb.mxu3 %v51_v14  ;;  %252 = vmatpush.msrb.mxu0 %v69_v38  ;;  %v81_v9 = vld [vmem:[#allocation2 + $0x148] sm:$0xff]  ;;  %v80_v11 = vld [vmem:[#allocation2 + $0x140] sm:$0xff]  ;;  %v79_v14 = vld [vmem:[#allocation2 + $0x138] sm:$0xff] }
  0x18   :  { %338 = vperm.xlu1 %584, %v333_v1   ;;  %v103_v34 = vld [vmem:[#allocation2 + $0x1f8] sm:$0xff]  ;;  %v102_v35 = vld [vmem:[#allocation2 + $0x1f0] sm:$0xff]  ;;  %v101_v37 = vld [vmem:[#allocation2 + $0x1e8] sm:$0xff] }
  0x19   :  { %208 = vmatpush.msrb.mxu3 %v50_v15  ;;  %253 = vmatpush.msrb.mxu0 %v68_v39  ;;  %v100_v38 = vld [vmem:[#allocation2 + $0x1e0] sm:$0xff] }
  0x1b   :  { %209 = vmatpush.msrb.mxu3 %v49_v17  ;;  %254 = vmatpush.msrb.mxu0 %v67_v41  ;;  %v78_v17 = vld [vmem:[#allocation2 + $0x130] sm:$0xff]  ;;  %v99_v41 = vld [vmem:[#allocation2 + $0x1d8] sm:$0xff] }
  0x1d   :  { %210 = vmatpush.msrb.mxu3 %v48_v19  ;;  %255 = vmatpush.msrb.mxu0 %v66_v42  ;;  %v77_v19 = vld [vmem:[#allocation2 + $0x128] sm:$0xff]  ;;  %v98_v42 = vld [vmem:[#allocation2 + $0x1d0] sm:$0xff] }
  0x1f   :  { %211 = vmatpush.msrb.mxu3 %v47_v22  ;;  %256 = vmatpush.msrb.mxu0 %v65_v43  ;;  %v372_v22 = vperm.slane %v719_v63, 4  ;;  %v97_v43 = vld [vmem:[#allocation2 + $0x1c8] sm:$0xff] }
  0x20   :  { %586 = vset.pattern.permute.xlu1 %v329_v10 }
  0x21   :  { %212 = vmatpush.msrb.mxu3 %v46_v24  ;;  %257 = vmatpush.msrb.mxu0 %v64_v44  ;;  %v74_v24 = vld [vmem:[#allocation2 + $0x110] sm:$0xff] }
  0x23   :  { %213 = vmatpush.msrb.mxu3 %v45_v27  ;;  %258 = vmatpush.msrb.mxu0 %v63_v47  ;;  %v95_v47 = vld [vmem:[#allocation2 + $0x1b8] sm:$0xff] }
  0x25   :  { %214 = vmatpush.msrb.mxu3 %v44_v28  ;;  %259 = vmatpush.msrb.mxu0 %v62_v49  ;;  %v94_v49 = vld [vmem:[#allocation2 + $0x1b0] sm:$0xff] }
  0x27   :  { %215 = vmatpush.msrb.mxu3 %v43_v29  ;;  %260 = vmatpush.msrb.mxu0 %v61_v51  ;;  %v92_v51 = vld [vmem:[#allocation2 + $0x1a0] sm:$0xff] }
  0x28   :  { %344 = vperm.xlu1 %586, %v333_v1  }
  0x29   :  { %216 = vmatpush.msrb.mxu3 %v42_v31  ;;  %261 = vmatpush.msrb.mxu0 %v60_v52  ;;  %v105_v31 = vld [vmem:[#allocation2 + $0x208] sm:$0xff]  ;;  %v597_v52 = vld [vmem:[#allocation2 + $0x3] ss:$0 sm:$0xff] }
  0x2b   :  { %262 = vmatpush.msrb.mxu0 %v59_v53  ;;  %v91_v53 = vld [vmem:[#allocation2 + $0x198] sm:$0xff] }
  0x2d   :  { %263 = vmatpush.msrb.mxu0 %v58_v54 }
  0x30   :  { %587 = vset.pattern.permute.xlu1 %v712_v60 }
  0x87   :  { %v132_v5 = vpop.f32.mrf.mxu0 }
  0x88   :  { %571 = vmatmul.msk.f32.vlgmr.msra.gmra.mxu3 %vm139_vm1, %v132_v5  ;;  %v346_v5 = vperm.slane %v719_v63, 2 }
  0x8a   :  { %351 = vperm.xlu2 %585, %v346_v5   ;;  %v339_v28 = vpop.permute.xlu1 %338 }
  0x8f   :  { %v135_v6 = vpop.f32.mrf.mxu0 }
  0x90   :  { %572 = vmatmul.msk.f32.gmra.mxu3 %vm139_vm1, %v135_v6 }
  0x92   :  { %588 = vset.pattern.permute.xlu2 %v329_v10 }
  0x9a   :  { %357 = vperm.xlu2 %588, %v346_v5  }
  0xe4   :  { %v352_v29 = vpop.permute.xlu2 %351 }
 0x10b   :  { %v163_v12 = vpop.f32.mrf.mxu3 }
 0x10c   :  { %v164_v20 = vadd.f32 %v594_v16, %v163_v12  ;;  %v596_v12 = vld [vmem:[#allocation2 + $0x2] ss:$0 sm:$0xff] }
 0x10e   :  { %v169_v25 = vmax.f32 %v164_v20, 0.0  ;;  %v76_v20 = vld [vmem:[#allocation2 + $0x120] sm:$0xff] }
 0x113   :  { %v166_v18 = vpop.f32.mrf.mxu3 }
 0x114   :  { %v167_v21 = vadd.f32 %v594_v16, %v166_v18  ;;  %v320_v16 = vperm.slane %v719_v63, 0 }
 0x116   :  { %v170_v23 = vmax.f32 %v167_v21, 0.0  ;;  %325 = vperm.xlu0 %583, %v320_v16   ;;  %v75_v21 = vld [vmem:[#allocation2 + $0x118] sm:$0xff] }
 0x118   :  { %191 = vmatpush.msra.mxu2 %v170_v23  ;;  %v359_v23 = vperm.slane %v719_v63, 3 }
 0x11a   :  { %192 = vmatpush.msra.mxu2 %v169_v25  ;;  %370 = vperm.xlu2 %588, %v359_v23   ;;  %v411_v25 = vperm.slane %v719_v63, 7 }
 0x11b   :  { %573 = vmatmul.msk.f32.vlgmr.msra.gmra.mxu2 %vm108_vm0, %v33_v26  ;;  %364 = vperm.xlu1 %587, %v359_v23  }
 0x11e   :  { %377 = vperm.xlu0 %583, %v372_v22  }
 0x122   :  { %591 = vset.pattern.permute.xlu2 %v712_v60 }
 0x123   :  { %574 = vmatmul.msk.f32.gmra.mxu2 %vm108_vm0, %v34_v30  ;;  %590 = vset.pattern.permute.xlu1 %v329_v10 }
 0x126   :  { %589 = vset.pattern.permute.xlu0 %v329_v10 }
 0x12b   :  { %383 = vperm.xlu1 %590, %v372_v22  }
 0x12e   :  { %331 = vperm.xlu0 %589, %v320_v16  }
 0x19e   :  { %v194_v32 = vpop.f32.mrf.mxu2 }
 0x19f   :  { %217 = vmatmul.f32.vlgmr.msrb.gmra.mxu3 %v194_v32  ;;  %v104_v32 = vld [vmem:[#allocation2 + $0x200] sm:$0xff] }
 0x1a6   :  { %v197_v33 = vpop.f32.mrf.mxu2 }
 0x1a7   :  { %220 = vmatmul.f32.gmra.mxu3 %v197_v33  ;;  %v358_v33 = vpop.permute.xlu2 %357 }
 0x1af   :  { %v371_v39 = vpop.permute.xlu2 %370 }
 0x222   :  { %v218_v40 = vpop.f32.mrf.mxu3 }
 0x223   :  { %v219_v50 = vadd.f32 %v595_v45, %v218_v40  ;;  %v326_v40 = vpop.permute.xlu0 %325 }
 0x22a   :  { %v221_v46 = vpop.f32.mrf.mxu3 }
 0x22b   :  { %v222_v48 = vadd.f32 %v595_v45, %v221_v46  ;;  %v96_v45 = vld [vmem:[#allocation2 + $0x1c0] sm:$0xff] }
 0x22d   :  { %238 = vmatpush.msra.mxu1 %v222_v48  ;;  %v378_v48 = vpop.permute.xlu0 %377 }
 0x22f   :  { %239 = vmatpush.msra.mxu1 %v219_v50  ;;  %v93_v50 = vld [vmem:[#allocation2 + $0x1a8] sm:$0xff] }
 0x230   :  { %575 = vmatmul.msk.f32.vlgmr.msra.gmra.mxu1 %vm108_vm0, %v33_v26 }
 0x231   :  { %295 = vmatpush.msrb.mxu1 %v89_v58 }
 0x233   :  { %296 = vmatpush.msrb.mxu1 %v88_v59 }
 0x235   :  { %297 = vmatpush.msrb.mxu1 %v87_v61  ;;  %v332_v59 = vpop.permute.xlu0 %331 }
 0x237   :  { %298 = vmatpush.msrb.mxu1 %v86_v62 }
 0x238   :  { %576 = vmatmul.msk.f32.gmra.mxu1 %vm108_vm0, %v34_v30  ;;  %v738_v30 = vpop.permute.xlu1 %344 }
 0x239   :  { %299 = vmatpush.msrb.mxu1 %v85_v0 }
 0x23b   :  { %300 = vmatpush.msrb.mxu1 %v84_v4 }
 0x23d   :  { %301 = vmatpush.msrb.mxu1 %v83_v7 }
 0x23f   :  { %302 = vmatpush.msrb.mxu1 %v82_v8 }
 0x240   :  { %v365_v36 = vpop.permute.xlu1 %364 }
 0x241   :  { %303 = vmatpush.msrb.mxu1 %v81_v9 }
 0x243   :  { %304 = vmatpush.msrb.mxu1 %v80_v11 }
 0x245   :  { %305 = vmatpush.msrb.mxu1 %v79_v14 }
 0x247   :  { %306 = vmatpush.msrb.mxu1 %v78_v17 }
 0x248   :  { %v384_v44 = vpop.permute.xlu1 %383 }
 0x249   :  { %307 = vmatpush.msrb.mxu1 %v77_v19 }
 0x24b   :  { %308 = vmatpush.msrb.mxu1 %v76_v20 }
 0x24d   :  { %309 = vmatpush.msrb.mxu1 %v75_v21 }
 0x24f   :  { %310 = vmatpush.msrb.mxu1 %v74_v24 }
 0x2ad   :  { %v241_v55 = vpop.f32.mrf.mxu1 }
 0x2ae   :  { %264 = vmatmul.f32.vlgmr.msrb.gmra.mxu0 %v241_v55 }
 0x2b5   :  { %v244_v56 = vpop.f32.mrf.mxu1 }
 0x2b6   :  { %267 = vmatmul.f32.gmra.mxu0 %v244_v56  ;;  %v90_v56 = vld [vmem:[#allocation2 + $0x190] sm:$0xff] }
 0x32b   :  { %v265_v6 = vpop.f32.mrf.mxu0 }
 0x32c   :  { %v266_v18 = vadd.f32 %v596_v12, %v265_v6 }
 0x333   :  { %v268_v13 = vpop.f32.mrf.mxu0 }
 0x334   :  { %v269_v15 = vadd.f32 %v596_v12, %v268_v13 }
 0x336   :  { %285 = vmatpush.msrb.mxu2 %v269_v15 }
 0x338   :  { %286 = vmatpush.msrb.mxu2 %v266_v18 }
 0x339   :  { %577 = vmatmul.msk.f32.vlgmr.msrb.gmra.mxu2 %vm108_vm0, %v691_v2  ;;  %v385_v2 = vperm.slane %v719_v63, 5 }
 0x33a   :  { %520 = vmatpush.msra.mxu2 %v105_v31 }
 0x33b   :  { %396 = vperm.xlu1 %590, %v385_v2   ;;  %390 = vperm.xlu2 %591, %v385_v2  }
 0x33c   :  { %521 = vmatpush.msra.mxu2 %v104_v32 }
 0x33e   :  { %522 = vmatpush.msra.mxu2 %v103_v34 }
 0x340   :  { %523 = vmatpush.msra.mxu2 %v102_v35 }
 0x341   :  { %578 = vmatmul.msk.f32.gmra.mxu2 %vm108_vm0, %v698_v3  ;;  %v398_v3 = vperm.slane %v719_v63, 6 }
 0x342   :  { %524 = vmatpush.msra.mxu2 %v101_v37 }
 0x343   :  { %592 = vset.pattern.permute.xlu1 %v712_v60  ;;  %409 = vperm.xlu0 %589, %v398_v3  }
 0x344   :  { %403 = vperm.xlu2 %591, %v398_v3   ;;  %525 = vmatpush.msra.mxu2 %v100_v38 }
 0x346   :  { %526 = vmatpush.msra.mxu2 %v99_v41 }
 0x348   :  { %527 = vmatpush.msra.mxu2 %v98_v42 }
 0x34a   :  { %528 = vmatpush.msra.mxu2 %v97_v43 }
 0x34b   :  { %416 = vperm.xlu1 %592, %v411_v25  }
 0x34c   :  { %593 = vset.pattern.permute.xlu2 %v329_v10  ;;  %529 = vmatpush.msra.mxu2 %v96_v45 }
 0x34e   :  { %530 = vmatpush.msra.mxu2 %v95_v47 }
 0x350   :  { %531 = vmatpush.msra.mxu2 %v94_v49 }
 0x352   :  { %532 = vmatpush.msra.mxu2 %v93_v50 }
 0x354   :  { %422 = vperm.xlu2 %593, %v411_v25   ;;  %533 = vmatpush.msra.mxu2 %v92_v51 }
 0x356   :  { %534 = vmatpush.msra.mxu2 %v91_v53 }
 0x358   :  { %535 = vmatpush.msra.mxu2 %v90_v56 }
 0x395   :  { %v391_v46 = vpop.permute.xlu2 %390 }
 0x39e   :  { %v404_v58 = vpop.permute.xlu2 %403 }
 0x3ad   :  { %v397_v55 = vpop.permute.xlu1 %396 }
 0x3ae   :  { %v423_v1 = vpop.permute.xlu2 %422 }
 0x3b5   :  { %v410_v8 = vpop.permute.xlu0 %409 }
 0x3bc   :  { %v288_v26 = vpop.f32.mrf.mxu2 }
 0x3bd   :  { %311 = vmatmul.f32.vlgmr.msrb.gmra.mxu1 %v288_v26  ;;  %v417_v62 = vpop.permute.xlu1 %416 }
 0x3c4   :  { %v291_v27 = vpop.f32.mrf.mxu2 }
 0x3c5   :  { %314 = vmatmul.f32.gmra.mxu1 %v291_v27 }
 0x43a   :  { %v312_v54 = vpop.f32.mrf.mxu1 }
 0x43b   :  { %v313_v57 = vadd.f32 %v597_v52, %v312_v54 }
 0x43d   :  { %v318_v60 = vmax.f32 %v313_v57, 0.0 }
 0x43f   :  { %v436_v0 = vadd.f32 %v404_v58, %v318_v60  ;;  %v438_v5 = vadd.f32 %v417_v62, %v318_v60  ;;  %v424_v6 = vadd.f32 %v326_v40, %v318_v60  ;;  %v426_v7 = vadd.f32 %v339_v28, %v318_v60 }
 0x440   :  { %v428_v9 = vadd.f32 %v352_v29, %v318_v60  ;;  %v430_v10 = vadd.f32 %v365_v36, %v318_v60  ;;  %v432_v11 = vadd.f32 %v378_v48, %v318_v60  ;;  %v434_v12 = vadd.f32 %v391_v46, %v318_v60 }
 0x442   :  { %v315_v61 = vpop.f32.mrf.mxu1 }
 0x443   :  { %v316_v63 = vadd.f32 %v597_v52, %v315_v61 }
 0x445   :  { %v319_v4 = vmax.f32 %v316_v63, 0.0 }
 0x447   :  { %v439_v13 = vadd.f32 %v423_v1, %v319_v4  ;;  %v437_v14 = vadd.f32 %v410_v8, %v319_v4  ;;  %v425_v15 = vadd.f32 %v332_v59, %v319_v4  ;;  %v427_v16 = vadd.f32 %v738_v30, %v319_v4 }
 0x448   :  { %v429_v17 = vadd.f32 %v358_v33, %v319_v4  ;;  %v431_v18 = vadd.f32 %v371_v39, %v319_v4  ;;  %v433_v19 = vadd.f32 %v384_v44, %v319_v4  ;;  %v435_v20 = vadd.f32 %v397_v55, %v319_v4 }
 0x449   :  { %v489_v21 = vmax.f32 %v438_v5, %v439_v13  ;;  %v482_v22 = vmax.f32 %v436_v0, %v437_v14  ;;  %v440_v23 = vmax.f32 %v424_v6, %v425_v15  ;;  %v447_v2 = vmax.f32 %v426_v7, %v427_v16 }
 0x44a   :  { %v454_v24 = vmax.f32 %v428_v9, %v429_v17  ;;  %v461_v3 = vmax.f32 %v430_v10, %v431_v18  ;;  %v468_v25 = vmax.f32 %v432_v11, %v433_v19  ;;  %v475_v26 = vmax.f32 %v434_v12, %v435_v20  ;;  %v598_v20 = vld [vmem:[#allocation2 + $0x4] ss:$0 sm:$0xff] }
 0x44b   :  { %v490_v27 = vrot.slane %v489_v21, 4  ;;  %v483_v28 = vrot.slane %v482_v22, 4  ;;  %v441_v29 = vrot.slane %v440_v23, 4  ;;  %v448_v31 = vrot.slane %v447_v2, 4 }
 0x44c   :  { %v455_v32 = vrot.slane %v454_v24, 4  ;;  %v462_v34 = vrot.slane %v461_v3, 4  ;;  %v469_v35 = vrot.slane %v468_v25, 4  ;;  %v476_v30 = vrot.slane %v475_v26, 4 }
 0x44d   :  { %v491_v33 = vmax.f32 %v489_v21, %v490_v27  ;;  %v484_v36 = vmax.f32 %v482_v22, %v483_v28  ;;  %v442_v37 = vmax.f32 %v440_v23, %v441_v29  ;;  %v449_v38 = vmax.f32 %v447_v2, %v448_v31 }
 0x44e   :  { %v456_v39 = vmax.f32 %v454_v24, %v455_v32  ;;  %v463_v40 = vmax.f32 %v461_v3, %v462_v34  ;;  %v470_v41 = vmax.f32 %v468_v25, %v469_v35  ;;  %v477_v42 = vmax.f32 %v475_v26, %v476_v30 }
 0x44f   :  { %v492_v43 = vrot.slane %v491_v33, 2  ;;  %v485_v44 = vrot.slane %v484_v36, 2  ;;  %v443_v45 = vrot.slane %v442_v37, 2  ;;  %v450_v46 = vrot.slane %v449_v38, 2 }
 0x450   :  { %v457_v47 = vrot.slane %v456_v39, 2  ;;  %v464_v48 = vrot.slane %v463_v40, 2  ;;  %v471_v49 = vrot.slane %v470_v41, 2  ;;  %v478_v50 = vrot.slane %v477_v42, 2 }
 0x451   :  { %v486_v51 = vmax.f32 %v484_v36, %v485_v44  ;;  %v444_v52 = vmax.f32 %v442_v37, %v443_v45  ;;  %v451_v53 = vmax.f32 %v449_v38, %v450_v46  ;;  %v493_v58 = vmax.f32 %v491_v33, %v492_v43 }
 0x452   :  { %v458_v54 = vmax.f32 %v456_v39, %v457_v47  ;;  %v465_v55 = vmax.f32 %v463_v40, %v464_v48  ;;  %v472_v56 = vmax.f32 %v470_v41, %v471_v49  ;;  %v479_v57 = vmax.f32 %v477_v42, %v478_v50 }
 0x453   :  { %v445_v59 = vrot.slane %v444_v52, 1  ;;  %v452_v60 = vrot.slane %v451_v53, 1  ;;  %v487_v5 = vrot.slane %v486_v51, 1  ;;  %v494_v7 = vrot.slane %v493_v58, 1 }
 0x454   :  { %v459_v61 = vrot.slane %v458_v54, 1  ;;  %v466_v62 = vrot.slane %v465_v55, 1  ;;  %v473_v63 = vrot.slane %v472_v56, 1  ;;  %v480_v4 = vrot.slane %v479_v57, 1 }
 0x455   :  { %v446_v0 = vmax.f32 %v444_v52, %v445_v59  ;;  %v453_v1 = vmax.f32 %v451_v53, %v452_v60  ;;  %v488_v14 = vmax.f32 %v486_v51, %v487_v5  ;;  %v495_v16 = vmax.f32 %v493_v58, %v494_v7 }
 0x456   :  { %v460_v6 = vmax.f32 %v458_v54, %v459_v61  ;;  %v467_v8 = vmax.f32 %v465_v55, %v466_v62  ;;  %v474_v10 = vmax.f32 %v472_v56, %v473_v63  ;;  %v481_v12 = vmax.f32 %v479_v57, %v480_v4 }
 0x457   :  { %v506_v9 = vsel %vm505_vm2, %v453_v1, %v446_v0 }
 0x458   :  { %v508_v11 = vsel %vm507_vm3, %v460_v6, %v506_v9 }
 0x459   :  { %v510_v13 = vsel %vm509_vm4, %v467_v8, %v508_v11 }
 0x45a   :  { %v512_v15 = vsel %vm511_vm5, %v474_v10, %v510_v13 }
 0x45b   :  { %v514_v17 = vsel %vm513_vm6, %v481_v12, %v512_v15 }
 0x45c   :  { %v516_v18 = vsel %vm515_vm7, %v488_v14, %v514_v17 }
 0x45d   :  { %v518_v19 = vsel %vm517_vm8, %v495_v16, %v516_v18 }
 0x45e   :  { %536 = vmatmul.f32.vlgmr.msra.gmra.mxu2 %v518_v19 }
 0x4e1   :  { %v537_v21 = vpop.f32.mrf.mxu2 }
 0x4e2   :  { %v538_v22 = vadd.f32 %v598_v20, %v537_v21 }
 0x4e4   :  { %540 = vmax.xlane.f32.xlu1 %v538_v22 }
 0x557   :  { %v541_v23 = vpop.xlane.xlu1 %540 }
 0x558   :  { %v542_v2 = vsub.f32 %v538_v22, %v541_v23 }
 0x55a   :  { %v543_v24 = vmul.f32 1.442695, %v542_v2 }
 0x55c   :  { %599 = vpow2.f32 %v543_v24 }
 0x562   :  { %v600_v3 = vpop.eup %599 }
 0x563   :  { %545 = vadd.xlane.f32.xlu2 %v600_v3 }
 0x5d6   :  { %v546_v25 = vpop.xlane.xlu2 %545 }
 0x5d7   :  { %601 = vlog2.f32 %v546_v25 }
 0x5dd   :  { %v602_v26 = vpop.eup %601 }
 0x5de   :  { %v548_v27 = vmul.f32 0.6931472, %v602_v26 }
 0x5e0   :  { %v549_v28 = vadd.f32 %v548_v27, %v541_v23 }
 0x5e2   :  { %v550_v29 = vsub.f32 %v538_v22, %v549_v28 }
 0x5e4   :  { %551 = vst [vmem:[#allocation5] sm:$0xff] %v550_v29 }
 0x5e5   :  { %562 = dma.vmem_to_hbm [thread:$0]  %s558_s4, 128, %s560_s7, [#allocation4]  }
 0x5e6   :  { %653 = dma.done.wait [#allocation4], 128  }
 0x5e7   :  { %654 = vsyncadd [#allocation4], 4294967168 }
 0x5e8   :  { %567 = vsyncpa [#allocation3], 1 }
 0x5e9   :  { %568 = vsyncpa [#allocation4], 1 }

</bundles_post_ra>
